<compile_context>
chip_gen: v7x
topology: tpu7x:2x2x1
jax: 0.10.0
libtpu: 0.0.40
codegen_flags: <defaults>
</compile_context>

<pallas_src>
import math

import jax
import jax.numpy as jnp
from jax.experimental import pallas as pl
from jax.experimental.pallas import tpu as pltpu

EPS = 1e-5


def _layernorm(x, gamma, beta):
    mu = jnp.mean(x, axis=-1, keepdims=True)
    var = jnp.mean(jnp.square(x - mu), axis=-1, keepdims=True)
    return (x - mu) * jax.lax.rsqrt(var + EPS) * gamma + beta


# ----------------- fused MNT token-pipeline kernel (one grid step = one image) ----------
def mnt_fused_kernel(
    patches_ref,                     # (TP, Cin*16) im2col slab (row 0 / tail rows are pad)
    addtok_ref,                      # (TP, C) row0 = cls+pos[0], rows 1..N = pos[1..N], rest 0
    pmask_ref,                       # (TP, 1)  1.0 on patch rows (1..N), else 0
    tmask_ref,                       # (TP, 1)  1.0 on valid token rows (0..T-1), else 0
    pw_ref, pb_ref, pg_ref, pbe_ref,                     # patch-embed matmul + LN
    w1_ref, b1_ref, w2_ref, b2_ref, g1_ref, be1_ref,     # shared FFN + LN1
    lpw_ref, lpb_ref, lpg_ref, lpbe_ref,                 # LocalPropagation (3 taps) + LN
    o_ref,                           # (TP, C)
):
    f32 = jnp.float32
    TP = patches_ref.shape[0]

    # 1) patch embedding: (TP, Cin*16) @ (Cin*16, C) + bias, LayerNorm; mask to patch rows
    pe = jnp.dot(patches_ref[...], pw_ref[...], preferred_element_type=f32) + pb_ref[...]
    pe = _layernorm(pe, pg_ref[...], pbe_ref[...])
    # row 0 -> cls+pos[0]; rows 1..N -> pe+pos; pad rows -> 0
    x = pe * pmask_ref[...] + addtok_ref[...]
    identity = x

    w1 = w1_ref[...]; b1 = b1_ref[...]; w2 = w2_ref[...]; b2 = b2_ref[...]
    g1 = g1_ref[...]; be1 = be1_ref[...]

    def ffn_block(z):                 # LN1(z + FFN(z)), weights reused by both blocks
        h = jax.nn.gelu(jnp.dot(z, w1, preferred_element_type=f32) + b1, approximate=True)
        y = jnp.dot(h, w2, preferred_element_type=f32) + b2
        return _layernorm(z + y, g1, be1)

    # 2) block 1
    x = ffn_block(x)

    # 3) LocalPropagation: depthwise 3-tap conv over the token (sublane) axis.
    #    Zero the pad rows first so the roll wrap-around injects zeros at both
    #    token boundaries (TP > T guarantees at least one zero row at the end).
    xm = x * tmask_ref[...]
    left = pltpu.roll(xm, 1, 0)        # left[t]  = xm[t-1]
    right = pltpu.roll(xm, TP - 1, 0)  # right[t] = xm[t+1]   (shift -1 mod TP)
    w = lpw_ref[...]                   # (3, C) depthwise taps
    y = left * w[0:1, :] + xm * w[1:2, :] + right * w[2:3, :] + lpb_ref[...]
    x = _layernorm(y, lpg_ref[...], lpbe_ref[...]) + identity

    # 4) block 2 (same FFN / LN1 weights)
    o_ref[...] = ffn_block(x)


# ----------------- parameter init (deterministic, synthetic) -----------------
def init_params(key, in_channels, embed_dim, hideF, num_patches):
    ks = jax.random.split(key, 6)
    s = 0.02
    f32 = jnp.float32
    return {
        "patch_w": s * jax.random.normal(ks[0], (in_channels * 16, embed_dim), f32),
        "patch_b": jnp.zeros((1, embed_dim), f32),
        "patch_g": jnp.ones((1, embed_dim), f32),
        "patch_beta": jnp.zeros((1, embed_dim), f32),
        "cls": s * jax.random.normal(ks[1], (1, 1, embed_dim), f32),
        "pos": s * jax.random.normal(ks[2], (1, num_patches + 1, embed_dim), f32),
        "ffn_w1": s * jax.random.normal(ks[3], (embed_dim, hideF), f32),
        "ffn_b1": jnp.zeros((1, hideF), f32),
        "ffn_w2": s * jax.random.normal(ks[4], (hideF, embed_dim), f32),
        "ffn_b2": jnp.zeros((1, embed_dim), f32),
        "ln1_g": jnp.ones((1, embed_dim), f32),
        "ln1_b": jnp.zeros((1, embed_dim), f32),
        "lp_w": s * jax.random.normal(ks[5], (3, embed_dim), f32),
        "lp_b": jnp.zeros((1, embed_dim), f32),
        "lp_g": jnp.ones((1, embed_dim), f32),
        "lp_beta": jnp.zeros((1, embed_dim), f32),
    }


def _factor_hw(N):
    sqrt_N = int(math.sqrt(N))
    factors = [(i, N // i) for i in range(sqrt_N, 0, -1) if N % i == 0]
    return factors[0] if factors else (sqrt_N, math.ceil(N / sqrt_N))


# ----------------- MNT forward (Pallas) -----------------
def mnt_forward(x_nchw, params):
    B, Cin, H, W = x_nchw.shape
    Hp, Wp = H // 4, W // 4
    N = Hp * Wp
    C = params["patch_w"].shape[1]
    F = params["ffn_w1"].shape[1]
    K = Cin * 16
    T = N + 1                               # +1 cls token
    TP = ((T + 8) // 8) * 8                 # pad tokens/image: multiple of 8, >= T+1

    # glue: im2col for the 4x4/stride-4 conv, feature order (c, kh, kw)
    patches = (x_nchw.reshape(B, Cin, Hp, 4, Wp, 4)
               .transpose(0, 2, 4, 1, 3, 5)
               .reshape(B, N, K))
    # per-image slab: row 0 = cls slot (zeros), rows 1..N = patches, tail = pad
    patches_slab = jnp.pad(patches, ((0, 0), (1, TP - T), (0, 0))).reshape(B * TP, K)

    pos = params["pos"][0]                  # (T, C)
    cls = params["cls"][0]                  # (1, C)
    addtok = jnp.concatenate([cls + pos[:1], pos[1:]], axis=0)      # (T, C)
    addtok = jnp.pad(addtok, ((0, TP - T), (0, 0)))                 # (TP, C)

    tok = jnp.arange(TP)[:, None]
    pmask = ((tok >= 1) & (tok < T)).astype(jnp.float32)            # (TP, 1)
    tmask = (tok < T).astype(jnp.float32)                           # (TP, 1)

    in_specs = [
        pl.BlockSpec((TP, K), lambda b: (b, 0)),   # patches slab (per image)
        pl.BlockSpec((TP, C), lambda b: (0, 0)),   # addtok
        pl.BlockSpec((TP, 1), lambda b: (0, 0)),   # pmask
        pl.BlockSpec((TP, 1), lambda b: (0, 0)),   # tmask
        pl.BlockSpec((K, C), lambda b: (0, 0)),    # patch_w
        pl.BlockSpec((1, C), lambda b: (0, 0)),    # patch_b
        pl.BlockSpec((1, C), lambda b: (0, 0)),    # patch_g
        pl.BlockSpec((1, C), lambda b: (0, 0)),    # patch_beta
        pl.BlockSpec((C, F), lambda b: (0, 0)),    # ffn_w1
        pl.BlockSpec((1, F), lambda b: (0, 0)),    # ffn_b1
        pl.BlockSpec((F, C), lambda b: (0, 0)),    # ffn_w2
        pl.BlockSpec((1, C), lambda b: (0, 0)),    # ffn_b2
        pl.BlockSpec((1, C), lambda b: (0, 0)),    # ln1_g
        pl.BlockSpec((1, C), lambda b: (0, 0)),    # ln1_b
        pl.BlockSpec((3, C), lambda b: (0, 0)),    # lp_w
        pl.BlockSpec((1, C), lambda b: (0, 0)),    # lp_b
        pl.BlockSpec((1, C), lambda b: (0, 0)),    # lp_g
        pl.BlockSpec((1, C), lambda b: (0, 0)),    # lp_beta
    ]

    out2d = pl.pallas_call(
        mnt_fused_kernel,
        out_shape=jax.ShapeDtypeStruct((B * TP, C), jnp.float32),
        grid=(B,),
        in_specs=in_specs,
        out_specs=pl.BlockSpec((TP, C), lambda b: (b, 0)),
        compiler_params=pltpu.CompilerParams(dimension_semantics=("parallel",)),
    )(patches_slab, addtok, pmask, tmask,
      params["patch_w"], params["patch_b"], params["patch_g"], params["patch_beta"],
      params["ffn_w1"], params["ffn_b1"], params["ffn_w2"], params["ffn_b2"],
      params["ln1_g"], params["ln1_b"],
      params["lp_w"], params["lp_b"], params["lp_g"], params["lp_beta"])

    # _reshape_to_bchw: drop cls token + pad rows, tokens -> (B, C, Hn, Wn)
    tokens = out2d.reshape(B, TP, C)[:, 1:T, :]
    Hn, Wn = _factor_hw(N)
    if Hn * Wn != N:
        tokens = jnp.pad(tokens, ((0, 0), (0, Hn * Wn - N), (0, 0)))
    return tokens.transpose(0, 2, 1).reshape(B, C, Hn, Wn)


# ----------------- pure-JAX reference (same math, no Pallas) -----------------
def ref_forward(x_nchw, p):
    B, Cin, H, W = x_nchw.shape
    Hp, Wp = H // 4, W // 4
    N = Hp * Wp
    C = p["patch_w"].shape[1]
    patches = (x_nchw.reshape(B, Cin, Hp, 4, Wp, 4)
               .transpose(0, 2, 4, 1, 3, 5)
               .reshape(B, N, Cin * 16))
    pe = _layernorm(patches @ p["patch_w"] + p["patch_b"], p["patch_g"], p["patch_beta"])
    cls = jnp.broadcast_to(p["cls"], (B, 1, C))
    x = jnp.concatenate([cls, pe], axis=1) + p["pos"]
    identity = x

    def ffn_block(z):
        h = jax.nn.gelu(z @ p["ffn_w1"] + p["ffn_b1"], approximate=True)
        y = h @ p["ffn_w2"] + p["ffn_b2"]
        return _layernorm(z + y, p["ln1_g"], p["ln1_b"])

    x = ffn_block(x)
    left = jnp.pad(x, ((0, 0), (1, 0), (0, 0)))[:, :-1, :]
    right = jnp.pad(x, ((0, 0), (0, 1), (0, 0)))[:, 1:, :]
    w = p["lp_w"]
    y = left * w[0] + x * w[1] + right * w[2] + p["lp_b"]
    x = _layernorm(y, p["lp_g"], p["lp_beta"]) + identity
    x = ffn_block(x)
    tokens = x[:, 1:, :]
    Hn, Wn = _factor_hw(N)
    return tokens.transpose(0, 2, 1).reshape(B, C, Hn, Wn)


if __name__ == "__main__":
    Height, Width = 16, 16
    in_channels, embed_dim, hideF, num_heads = 4, 32, 64, 4
    num_patches = Height * Width // 16      # 16 patches -> 4x4 grid

    key = jax.random.PRNGKey(0)
    kx, kp = jax.random.split(key)
    x = jax.random.normal(kx, (2, in_channels, Height, Width), jnp.float32)
    params = init_params(kp, in_channels, embed_dim, hideF, num_patches)

    fwd = jax.jit(mnt_forward)
    out = jax.block_until_ready(fwd(x, params))

    ref = ref_forward(x, params)
    assert out.shape == (2, embed_dim, 4, 4), out.shape
    assert jnp.allclose(out, ref, rtol=2e-3, atol=2e-3), float(jnp.max(jnp.abs(out - ref)))
    print("KERNEL_OK")
</pallas_src>

<mosaic_0001>
module attributes {stable_mosaic.version = 11 : i64} {
  func.func @mnt_fused_kernel(%arg0: i32, %arg1: memref<24x64xf32, #tpu.memory_space<vmem>>, %arg2: memref<24x32xf32, #tpu.memory_space<vmem>>, %arg3: memref<24x1xf32, #tpu.memory_space<vmem>>, %arg4: memref<24x1xf32, #tpu.memory_space<vmem>>, %arg5: memref<64x32xf32, #tpu.memory_space<vmem>>, %arg6: memref<1x32xf32, #tpu.memory_space<vmem>>, %arg7: memref<1x32xf32, #tpu.memory_space<vmem>>, %arg8: memref<1x32xf32, #tpu.memory_space<vmem>>, %arg9: memref<32x64xf32, #tpu.memory_space<vmem>>, %arg10: memref<1x64xf32, #tpu.memory_space<vmem>>, %arg11: memref<64x32xf32, #tpu.memory_space<vmem>>, %arg12: memref<1x32xf32, #tpu.memory_space<vmem>>, %arg13: memref<1x32xf32, #tpu.memory_space<vmem>>, %arg14: memref<1x32xf32, #tpu.memory_space<vmem>>, %arg15: memref<3x32xf32, #tpu.memory_space<vmem>>, %arg16: memref<1x32xf32, #tpu.memory_space<vmem>>, %arg17: memref<1x32xf32, #tpu.memory_space<vmem>>, %arg18: memref<1x32xf32, #tpu.memory_space<vmem>>, %arg19: memref<24x32xf32, #tpu.memory_space<vmem>>) attributes {dimension_semantics = [#tpu.dimension_semantics<parallel>], iteration_bounds = array<i64: 2>, scalar_prefetch = 0 : i64, scratch_operands = 0 : i64, tpu.core_type = #tpu.core_type<tc>, window_params = [{transform_indices = @transform_0, window_bounds = array<i64: 24, 64>}, {pipeline_mode = #tpu.pipeline_mode<synchronous>, transform_indices = @transform_1, window_bounds = array<i64: 24, 32>}, {pipeline_mode = #tpu.pipeline_mode<synchronous>, transform_indices = @transform_2, window_bounds = array<i64: 24, 1>}, {pipeline_mode = #tpu.pipeline_mode<synchronous>, transform_indices = @transform_3, window_bounds = array<i64: 24, 1>}, {pipeline_mode = #tpu.pipeline_mode<synchronous>, transform_indices = @transform_4, window_bounds = array<i64: 64, 32>}, {pipeline_mode = #tpu.pipeline_mode<synchronous>, transform_indices = @transform_5, window_bounds = array<i64: 1, 32>}, {pipeline_mode = #tpu.pipeline_mode<synchronous>, transform_indices = @transform_6, window_bounds = array<i64: 1, 32>}, {pipeline_mode = #tpu.pipeline_mode<synchronous>, transform_indices = @transform_7, window_bounds = array<i64: 1, 32>}, {pipeline_mode = #tpu.pipeline_mode<synchronous>, transform_indices = @transform_8, window_bounds = array<i64: 32, 64>}, {pipeline_mode = #tpu.pipeline_mode<synchronous>, transform_indices = @transform_9, window_bounds = array<i64: 1, 64>}, {pipeline_mode = #tpu.pipeline_mode<synchronous>, transform_indices = @transform_10, window_bounds = array<i64: 64, 32>}, {pipeline_mode = #tpu.pipeline_mode<synchronous>, transform_indices = @transform_11, window_bounds = array<i64: 1, 32>}, {pipeline_mode = #tpu.pipeline_mode<synchronous>, transform_indices = @transform_12, window_bounds = array<i64: 1, 32>}, {pipeline_mode = #tpu.pipeline_mode<synchronous>, transform_indices = @transform_13, window_bounds = array<i64: 1, 32>}, {pipeline_mode = #tpu.pipeline_mode<synchronous>, transform_indices = @transform_14, window_bounds = array<i64: 3, 32>}, {pipeline_mode = #tpu.pipeline_mode<synchronous>, transform_indices = @transform_15, window_bounds = array<i64: 1, 32>}, {pipeline_mode = #tpu.pipeline_mode<synchronous>, transform_indices = @transform_16, window_bounds = array<i64: 1, 32>}, {pipeline_mode = #tpu.pipeline_mode<synchronous>, transform_indices = @transform_17, window_bounds = array<i64: 1, 32>}, {transform_indices = @transform_18, window_bounds = array<i64: 24, 32>}]} {
    %c0 = arith.constant 0 : index
    %c0_0 = arith.constant 0 : index
    %0 = vector.load %arg1[%c0, %c0_0] : memref<24x64xf32, #tpu.memory_space<vmem>>, vector<24x64xf32>
    %c0_1 = arith.constant 0 : index
    %c0_2 = arith.constant 0 : index
    %1 = vector.load %arg5[%c0_1, %c0_2] : memref<64x32xf32, #tpu.memory_space<vmem>>, vector<64x32xf32>
    %cst = arith.constant dense<0.000000e+00> : vector<24x32xf32>
    %2 = tpu.matmul %0, %1, %cst {dimension_numbers = #tpu.dot_dimension_numbers<[1], [0], [0], [1], [0, 0, 1, 1], [], []>} : vector<24x64xf32>, vector<64x32xf32>, vector<24x32xf32> -> vector<24x32xf32>
    %c0_3 = arith.constant 0 : index
    %c0_4 = arith.constant 0 : index
    %3 = vector.load %arg6[%c0_3, %c0_4] : memref<1x32xf32, #tpu.memory_space<vmem>>, vector<1x32xf32>
    %4 = vector.broadcast %3 : vector<1x32xf32> to vector<24x32xf32>
    %5 = arith.addf %2, %4 : vector<24x32xf32>
    %c0_5 = arith.constant 0 : index
    %c0_6 = arith.constant 0 : index
    %6 = vector.load %arg7[%c0_5, %c0_6] : memref<1x32xf32, #tpu.memory_space<vmem>>, vector<1x32xf32>
    %c0_7 = arith.constant 0 : index
    %c0_8 = arith.constant 0 : index
    %7 = vector.load %arg8[%c0_7, %c0_8] : memref<1x32xf32, #tpu.memory_space<vmem>>, vector<1x32xf32>
    %cst_9 = arith.constant dense<0.000000e+00> : vector<24xf32>
    %8 = vector.multi_reduction <add>, %5, %cst_9 [1] : vector<24x32xf32> to vector<24xf32>
    %9 = vector.shape_cast %8 : vector<24xf32> to vector<24x1xf32>
    %cst_10 = arith.constant 3.200000e+01 : f32
    %10 = vector.broadcast %cst_10 : f32 to vector<24x1xf32>
    %11 = arith.divf %9, %10 : vector<24x1xf32>
    %12 = vector.broadcast %11 : vector<24x1xf32> to vector<24x32xf32>
    %13 = arith.subf %5, %12 : vector<24x32xf32>
    %14 = arith.mulf %13, %13 : vector<24x32xf32>
    %cst_11 = arith.constant dense<0.000000e+00> : vector<24xf32>
    %15 = vector.multi_reduction <add>, %14, %cst_11 [1] : vector<24x32xf32> to vector<24xf32>
    %16 = vector.shape_cast %15 : vector<24xf32> to vector<24x1xf32>
    %cst_12 = arith.constant 3.200000e+01 : f32
    %17 = vector.broadcast %cst_12 : f32 to vector<24x1xf32>
    %18 = arith.divf %16, %17 : vector<24x1xf32>
    %19 = vector.broadcast %11 : vector<24x1xf32> to vector<24x32xf32>
    %20 = arith.subf %5, %19 : vector<24x32xf32>
    %cst_13 = arith.constant 9.99999974E-6 : f32
    %21 = vector.broadcast %cst_13 : f32 to vector<24x1xf32>
    %22 = arith.addf %18, %21 : vector<24x1xf32>
    %23 = math.rsqrt %22 : vector<24x1xf32>
    %24 = vector.broadcast %23 : vector<24x1xf32> to vector<24x32xf32>
    %25 = arith.mulf %20, %24 : vector<24x32xf32>
    %26 = vector.broadcast %6 : vector<1x32xf32> to vector<24x32xf32>
    %27 = arith.mulf %25, %26 : vector<24x32xf32>
    %28 = vector.broadcast %7 : vector<1x32xf32> to vector<24x32xf32>
    %29 = arith.addf %27, %28 : vector<24x32xf32>
    %c0_14 = arith.constant 0 : index
    %c0_15 = arith.constant 0 : index
    %30 = vector.load %arg3[%c0_14, %c0_15] : memref<24x1xf32, #tpu.memory_space<vmem>>, vector<24x1xf32>
    %31 = vector.broadcast %30 : vector<24x1xf32> to vector<24x32xf32>
    %32 = arith.mulf %29, %31 : vector<24x32xf32>
    %c0_16 = arith.constant 0 : index
    %c0_17 = arith.constant 0 : index
    %33 = vector.load %arg2[%c0_16, %c0_17] : memref<24x32xf32, #tpu.memory_space<vmem>>, vector<24x32xf32>
    %34 = arith.addf %32, %33 : vector<24x32xf32>
    %c0_18 = arith.constant 0 : index
    %c0_19 = arith.constant 0 : index
    %35 = vector.load %arg9[%c0_18, %c0_19] : memref<32x64xf32, #tpu.memory_space<vmem>>, vector<32x64xf32>
    %c0_20 = arith.constant 0 : index
    %c0_21 = arith.constant 0 : index
    %36 = vector.load %arg10[%c0_20, %c0_21] : memref<1x64xf32, #tpu.memory_space<vmem>>, vector<1x64xf32>
    %c0_22 = arith.constant 0 : index
    %c0_23 = arith.constant 0 : index
    %37 = vector.load %arg11[%c0_22, %c0_23] : memref<64x32xf32, #tpu.memory_space<vmem>>, vector<64x32xf32>
    %c0_24 = arith.constant 0 : index
    %c0_25 = arith.constant 0 : index
    %38 = vector.load %arg12[%c0_24, %c0_25] : memref<1x32xf32, #tpu.memory_space<vmem>>, vector<1x32xf32>
    %c0_26 = arith.constant 0 : index
    %c0_27 = arith.constant 0 : index
    %39 = vector.load %arg13[%c0_26, %c0_27] : memref<1x32xf32, #tpu.memory_space<vmem>>, vector<1x32xf32>
    %c0_28 = arith.constant 0 : index
    %c0_29 = arith.constant 0 : index
    %40 = vector.load %arg14[%c0_28, %c0_29] : memref<1x32xf32, #tpu.memory_space<vmem>>, vector<1x32xf32>
    %cst_30 = arith.constant dense<0.000000e+00> : vector<24x64xf32>
    %41 = tpu.matmul %34, %35, %cst_30 {dimension_numbers = #tpu.dot_dimension_numbers<[1], [0], [0], [1], [0, 0, 1, 1], [], []>} : vector<24x32xf32>, vector<32x64xf32>, vector<24x64xf32> -> vector<24x64xf32>
    %42 = vector.broadcast %36 : vector<1x64xf32> to vector<24x64xf32>
    %43 = arith.addf %41, %42 : vector<24x64xf32>
    %44 = arith.mulf %43, %43 : vector<24x64xf32>
    %45 = arith.mulf %43, %44 : vector<24x64xf32>
    %cst_31 = arith.constant 4.471500e-02 : f32
    %46 = vector.broadcast %cst_31 : f32 to vector<24x64xf32>
    %47 = arith.mulf %46, %45 : vector<24x64xf32>
    %48 = arith.addf %43, %47 : vector<24x64xf32>
    %cst_32 = arith.constant 0.797884583 : f32
    %49 = vector.broadcast %cst_32 : f32 to vector<24x64xf32>
    %50 = arith.mulf %49, %48 : vector<24x64xf32>
    %51 = math.tanh %50 : vector<24x64xf32>
    %cst_33 = arith.constant 1.000000e+00 : f32
    %52 = vector.broadcast %cst_33 : f32 to vector<24x64xf32>
    %53 = arith.addf %52, %51 : vector<24x64xf32>
    %cst_34 = arith.constant 5.000000e-01 : f32
    %54 = vector.broadcast %cst_34 : f32 to vector<24x64xf32>
    %55 = arith.mulf %54, %53 : vector<24x64xf32>
    %56 = arith.mulf %43, %55 : vector<24x64xf32>
    %cst_35 = arith.constant dense<0.000000e+00> : vector<24x32xf32>
    %57 = tpu.matmul %56, %37, %cst_35 {dimension_numbers = #tpu.dot_dimension_numbers<[1], [0], [0], [1], [0, 0, 1, 1], [], []>} : vector<24x64xf32>, vector<64x32xf32>, vector<24x32xf32> -> vector<24x32xf32>
    %58 = vector.broadcast %38 : vector<1x32xf32> to vector<24x32xf32>
    %59 = arith.addf %57, %58 : vector<24x32xf32>
    %60 = arith.addf %34, %59 : vector<24x32xf32>
    %cst_36 = arith.constant dense<0.000000e+00> : vector<24xf32>
    %61 = vector.multi_reduction <add>, %60, %cst_36 [1] : vector<24x32xf32> to vector<24xf32>
    %62 = vector.shape_cast %61 : vector<24xf32> to vector<24x1xf32>
    %cst_37 = arith.constant 3.200000e+01 : f32
    %63 = vector.broadcast %cst_37 : f32 to vector<24x1xf32>
    %64 = arith.divf %62, %63 : vector<24x1xf32>
    %65 = vector.broadcast %64 : vector<24x1xf32> to vector<24x32xf32>
    %66 = arith.subf %60, %65 : vector<24x32xf32>
    %67 = arith.mulf %66, %66 : vector<24x32xf32>
    %cst_38 = arith.constant dense<0.000000e+00> : vector<24xf32>
    %68 = vector.multi_reduction <add>, %67, %cst_38 [1] : vector<24x32xf32> to vector<24xf32>
    %69 = vector.shape_cast %68 : vector<24xf32> to vector<24x1xf32>
    %cst_39 = arith.constant 3.200000e+01 : f32
    %70 = vector.broadcast %cst_39 : f32 to vector<24x1xf32>
    %71 = arith.divf %69, %70 : vector<24x1xf32>
    %72 = vector.broadcast %64 : vector<24x1xf32> to vector<24x32xf32>
    %73 = arith.subf %60, %72 : vector<24x32xf32>
    %cst_40 = arith.constant 9.99999974E-6 : f32
    %74 = vector.broadcast %cst_40 : f32 to vector<24x1xf32>
    %75 = arith.addf %71, %74 : vector<24x1xf32>
    %76 = math.rsqrt %75 : vector<24x1xf32>
    %77 = vector.broadcast %76 : vector<24x1xf32> to vector<24x32xf32>
    %78 = arith.mulf %73, %77 : vector<24x32xf32>
    %79 = vector.broadcast %39 : vector<1x32xf32> to vector<24x32xf32>
    %80 = arith.mulf %78, %79 : vector<24x32xf32>
    %81 = vector.broadcast %40 : vector<1x32xf32> to vector<24x32xf32>
    %82 = arith.addf %80, %81 : vector<24x32xf32>
    %c0_41 = arith.constant 0 : index
    %c0_42 = arith.constant 0 : index
    %83 = vector.load %arg4[%c0_41, %c0_42] : memref<24x1xf32, #tpu.memory_space<vmem>>, vector<24x1xf32>
    %84 = vector.broadcast %83 : vector<24x1xf32> to vector<24x32xf32>
    %85 = arith.mulf %82, %84 : vector<24x32xf32>
    %c1_i32 = arith.constant 1 : i32
    %86 = tpu.dynamic_rotate %85 by %c1_i32 dim 0 : vector<24x32xf32>, i32 -> vector<24x32xf32>
    %c23_i32 = arith.constant 23 : i32
    %87 = tpu.dynamic_rotate %85 by %c23_i32 dim 0 : vector<24x32xf32>, i32 -> vector<24x32xf32>
    %c0_43 = arith.constant 0 : index
    %c0_44 = arith.constant 0 : index
    %88 = vector.load %arg15[%c0_43, %c0_44] : memref<3x32xf32, #tpu.memory_space<vmem>>, vector<3x32xf32>
    %89 = vector.extract_strided_slice %88 {offsets = [0, 0], sizes = [1, 32], strides = [1, 1]} : vector<3x32xf32> to vector<1x32xf32>
    %90 = vector.broadcast %89 : vector<1x32xf32> to vector<24x32xf32>
    %91 = arith.mulf %86, %90 : vector<24x32xf32>
    %92 = vector.extract_strided_slice %88 {offsets = [1, 0], sizes = [1, 32], strides = [1, 1]} : vector<3x32xf32> to vector<1x32xf32>
    %93 = vector.broadcast %92 : vector<1x32xf32> to vector<24x32xf32>
    %94 = arith.mulf %85, %93 : vector<24x32xf32>
    %95 = arith.addf %91, %94 : vector<24x32xf32>
    %96 = vector.extract_strided_slice %88 {offsets = [2, 0], sizes = [1, 32], strides = [1, 1]} : vector<3x32xf32> to vector<1x32xf32>
    %97 = vector.broadcast %96 : vector<1x32xf32> to vector<24x32xf32>
    %98 = arith.mulf %87, %97 : vector<24x32xf32>
    %99 = arith.addf %95, %98 : vector<24x32xf32>
    %c0_45 = arith.constant 0 : index
    %c0_46 = arith.constant 0 : index
    %100 = vector.load %arg16[%c0_45, %c0_46] : memref<1x32xf32, #tpu.memory_space<vmem>>, vector<1x32xf32>
    %101 = vector.broadcast %100 : vector<1x32xf32> to vector<24x32xf32>
    %102 = arith.addf %99, %101 : vector<24x32xf32>
    %c0_47 = arith.constant 0 : index
    %c0_48 = arith.constant 0 : index
    %103 = vector.load %arg17[%c0_47, %c0_48] : memref<1x32xf32, #tpu.memory_space<vmem>>, vector<1x32xf32>
    %c0_49 = arith.constant 0 : index
    %c0_50 = arith.constant 0 : index
    %104 = vector.load %arg18[%c0_49, %c0_50] : memref<1x32xf32, #tpu.memory_space<vmem>>, vector<1x32xf32>
    %cst_51 = arith.constant dense<0.000000e+00> : vector<24xf32>
    %105 = vector.multi_reduction <add>, %102, %cst_51 [1] : vector<24x32xf32> to vector<24xf32>
    %106 = vector.shape_cast %105 : vector<24xf32> to vector<24x1xf32>
    %cst_52 = arith.constant 3.200000e+01 : f32
    %107 = vector.broadcast %cst_52 : f32 to vector<24x1xf32>
    %108 = arith.divf %106, %107 : vector<24x1xf32>
    %109 = vector.broadcast %108 : vector<24x1xf32> to vector<24x32xf32>
    %110 = arith.subf %102, %109 : vector<24x32xf32>
    %111 = arith.mulf %110, %110 : vector<24x32xf32>
    %cst_53 = arith.constant dense<0.000000e+00> : vector<24xf32>
    %112 = vector.multi_reduction <add>, %111, %cst_53 [1] : vector<24x32xf32> to vector<24xf32>
    %113 = vector.shape_cast %112 : vector<24xf32> to vector<24x1xf32>
    %cst_54 = arith.constant 3.200000e+01 : f32
    %114 = vector.broadcast %cst_54 : f32 to vector<24x1xf32>
    %115 = arith.divf %113, %114 : vector<24x1xf32>
    %116 = vector.broadcast %108 : vector<24x1xf32> to vector<24x32xf32>
    %117 = arith.subf %102, %116 : vector<24x32xf32>
    %cst_55 = arith.constant 9.99999974E-6 : f32
    %118 = vector.broadcast %cst_55 : f32 to vector<24x1xf32>
    %119 = arith.addf %115, %118 : vector<24x1xf32>
    %120 = math.rsqrt %119 : vector<24x1xf32>
    %121 = vector.broadcast %120 : vector<24x1xf32> to vector<24x32xf32>
    %122 = arith.mulf %117, %121 : vector<24x32xf32>
    %123 = vector.broadcast %103 : vector<1x32xf32> to vector<24x32xf32>
    %124 = arith.mulf %122, %123 : vector<24x32xf32>
    %125 = vector.broadcast %104 : vector<1x32xf32> to vector<24x32xf32>
    %126 = arith.addf %124, %125 : vector<24x32xf32>
    %127 = arith.addf %126, %34 : vector<24x32xf32>
    %cst_56 = arith.constant dense<0.000000e+00> : vector<24x64xf32>
    %128 = tpu.matmul %127, %35, %cst_56 {dimension_numbers = #tpu.dot_dimension_numbers<[1], [0], [0], [1], [0, 0, 1, 1], [], []>} : vector<24x32xf32>, vector<32x64xf32>, vector<24x64xf32> -> vector<24x64xf32>
    %129 = vector.broadcast %36 : vector<1x64xf32> to vector<24x64xf32>
    %130 = arith.addf %128, %129 : vector<24x64xf32>
    %131 = arith.mulf %130, %130 : vector<24x64xf32>
    %132 = arith.mulf %130, %131 : vector<24x64xf32>
    %cst_57 = arith.constant 4.471500e-02 : f32
    %133 = vector.broadcast %cst_57 : f32 to vector<24x64xf32>
    %134 = arith.mulf %133, %132 : vector<24x64xf32>
    %135 = arith.addf %130, %134 : vector<24x64xf32>
    %cst_58 = arith.constant 0.797884583 : f32
    %136 = vector.broadcast %cst_58 : f32 to vector<24x64xf32>
    %137 = arith.mulf %136, %135 : vector<24x64xf32>
    %138 = math.tanh %137 : vector<24x64xf32>
    %cst_59 = arith.constant 1.000000e+00 : f32
    %139 = vector.broadcast %cst_59 : f32 to vector<24x64xf32>
    %140 = arith.addf %139, %138 : vector<24x64xf32>
    %cst_60 = arith.constant 5.000000e-01 : f32
    %141 = vector.broadcast %cst_60 : f32 to vector<24x64xf32>
    %142 = arith.mulf %141, %140 : vector<24x64xf32>
    %143 = arith.mulf %130, %142 : vector<24x64xf32>
    %cst_61 = arith.constant dense<0.000000e+00> : vector<24x32xf32>
    %144 = tpu.matmul %143, %37, %cst_61 {dimension_numbers = #tpu.dot_dimension_numbers<[1], [0], [0], [1], [0, 0, 1, 1], [], []>} : vector<24x64xf32>, vector<64x32xf32>, vector<24x32xf32> -> vector<24x32xf32>
    %145 = vector.broadcast %38 : vector<1x32xf32> to vector<24x32xf32>
    %146 = arith.addf %144, %145 : vector<24x32xf32>
    %147 = arith.addf %127, %146 : vector<24x32xf32>
    %cst_62 = arith.constant dense<0.000000e+00> : vector<24xf32>
    %148 = vector.multi_reduction <add>, %147, %cst_62 [1] : vector<24x32xf32> to vector<24xf32>
    %149 = vector.shape_cast %148 : vector<24xf32> to vector<24x1xf32>
    %cst_63 = arith.constant 3.200000e+01 : f32
    %150 = vector.broadcast %cst_63 : f32 to vector<24x1xf32>
    %151 = arith.divf %149, %150 : vector<24x1xf32>
    %152 = vector.broadcast %151 : vector<24x1xf32> to vector<24x32xf32>
    %153 = arith.subf %147, %152 : vector<24x32xf32>
    %154 = arith.mulf %153, %153 : vector<24x32xf32>
    %cst_64 = arith.constant dense<0.000000e+00> : vector<24xf32>
    %155 = vector.multi_reduction <add>, %154, %cst_64 [1] : vector<24x32xf32> to vector<24xf32>
    %156 = vector.shape_cast %155 : vector<24xf32> to vector<24x1xf32>
    %cst_65 = arith.constant 3.200000e+01 : f32
    %157 = vector.broadcast %cst_65 : f32 to vector<24x1xf32>
    %158 = arith.divf %156, %157 : vector<24x1xf32>
    %159 = vector.broadcast %151 : vector<24x1xf32> to vector<24x32xf32>
    %160 = arith.subf %147, %159 : vector<24x32xf32>
    %cst_66 = arith.constant 9.99999974E-6 : f32
    %161 = vector.broadcast %cst_66 : f32 to vector<24x1xf32>
    %162 = arith.addf %158, %161 : vector<24x1xf32>
    %163 = math.rsqrt %162 : vector<24x1xf32>
    %164 = vector.broadcast %163 : vector<24x1xf32> to vector<24x32xf32>
    %165 = arith.mulf %160, %164 : vector<24x32xf32>
    %166 = vector.broadcast %39 : vector<1x32xf32> to vector<24x32xf32>
    %167 = arith.mulf %165, %166 : vector<24x32xf32>
    %168 = vector.broadcast %40 : vector<1x32xf32> to vector<24x32xf32>
    %169 = arith.addf %167, %168 : vector<24x32xf32>
    %c0_67 = arith.constant 0 : index
    %c0_68 = arith.constant 0 : index
    %170 = vector.load %arg19[%c0_67, %c0_68] : memref<24x32xf32, #tpu.memory_space<vmem>>, vector<24x32xf32>
    tpu.vector_store %arg19[%c0_67, %c0_68], %169 {strides = array<i32>} : memref<24x32xf32, #tpu.memory_space<vmem>>, vector<24x32xf32>,
    return
  }
  func.func @transform_0(%arg0: i32) -> (i32, i32) {
    %c0_i32 = arith.constant 0 : i32
    %c0_i32_0 = arith.constant 0 : i32
    return %arg0, %c0_i32 : i32, i32
  }
  func.func @transform_1(%arg0: i32) -> (i32, i32) {
    %c0_i32 = arith.constant 0 : i32
    %c0_i32_0 = arith.constant 0 : i32
    %c0_i32_1 = arith.constant 0 : i32
    return %c0_i32, %c0_i32_0 : i32, i32
  }
  func.func @transform_2(%arg0: i32) -> (i32, i32) {
    %c0_i32 = arith.constant 0 : i32
    %c0_i32_0 = arith.constant 0 : i32
    %c0_i32_1 = arith.constant 0 : i32
    return %c0_i32, %c0_i32_0 : i32, i32
  }
  func.func @transform_3(%arg0: i32) -> (i32, i32) {
    %c0_i32 = arith.constant 0 : i32
    %c0_i32_0 = arith.constant 0 : i32
    %c0_i32_1 = arith.constant 0 : i32
    return %c0_i32, %c0_i32_0 : i32, i32
  }
  func.func @transform_4(%arg0: i32) -> (i32, i32) {
    %c0_i32 = arith.constant 0 : i32
    %c0_i32_0 = arith.constant 0 : i32
    %c0_i32_1 = arith.constant 0 : i32
    return %c0_i32, %c0_i32_0 : i32, i32
  }
  func.func @transform_5(%arg0: i32) -> (i32, i32) {
    %c0_i32 = arith.constant 0 : i32
    %c0_i32_0 = arith.constant 0 : i32
    %c0_i32_1 = arith.constant 0 : i32
    return %c0_i32, %c0_i32_0 : i32, i32
  }
  func.func @transform_6(%arg0: i32) -> (i32, i32) {
    %c0_i32 = arith.constant 0 : i32
    %c0_i32_0 = arith.constant 0 : i32
    %c0_i32_1 = arith.constant 0 : i32
    return %c0_i32, %c0_i32_0 : i32, i32
  }
  func.func @transform_7(%arg0: i32) -> (i32, i32) {
    %c0_i32 = arith.constant 0 : i32
    %c0_i32_0 = arith.constant 0 : i32
    %c0_i32_1 = arith.constant 0 : i32
    return %c0_i32, %c0_i32_0 : i32, i32
  }
  func.func @transform_8(%arg0: i32) -> (i32, i32) {
    %c0_i32 = arith.constant 0 : i32
    %c0_i32_0 = arith.constant 0 : i32
    %c0_i32_1 = arith.constant 0 : i32
    return %c0_i32, %c0_i32_0 : i32, i32
  }
  func.func @transform_9(%arg0: i32) -> (i32, i32) {
    %c0_i32 = arith.constant 0 : i32
    %c0_i32_0 = arith.constant 0 : i32
    %c0_i32_1 = arith.constant 0 : i32
    return %c0_i32, %c0_i32_0 : i32, i32
  }
  func.func @transform_10(%arg0: i32) -> (i32, i32) {
    %c0_i32 = arith.constant 0 : i32
    %c0_i32_0 = arith.constant 0 : i32
    %c0_i32_1 = arith.constant 0 : i32
    return %c0_i32, %c0_i32_0 : i32, i32
  }
  func.func @transform_11(%arg0: i32) -> (i32, i32) {
    %c0_i32 = arith.constant 0 : i32
    %c0_i32_0 = arith.constant 0 : i32
    %c0_i32_1 = arith.constant 0 : i32
    return %c0_i32, %c0_i32_0 : i32, i32
  }
  func.func @transform_12(%arg0: i32) -> (i32, i32) {
    %c0_i32 = arith.constant 0 : i32
    %c0_i32_0 = arith.constant 0 : i32
    %c0_i32_1 = arith.constant 0 : i32
    return %c0_i32, %c0_i32_0 : i32, i32
  }
  func.func @transform_13(%arg0: i32) -> (i32, i32) {
    %c0_i32 = arith.constant 0 : i32
    %c0_i32_0 = arith.constant 0 : i32
    %c0_i32_1 = arith.constant 0 : i32
    return %c0_i32, %c0_i32_0 : i32, i32
  }
  func.func @transform_14(%arg0: i32) -> (i32, i32) {
    %c0_i32 = arith.constant 0 : i32
    %c0_i32_0 = arith.constant 0 : i32
    %c0_i32_1 = arith.constant 0 : i32
    return %c0_i32, %c0_i32_0 : i32, i32
  }
  func.func @transform_15(%arg0: i32) -> (i32, i32) {
    %c0_i32 = arith.constant 0 : i32
    %c0_i32_0 = arith.constant 0 : i32
    %c0_i32_1 = arith.constant 0 : i32
    return %c0_i32, %c0_i32_0 : i32, i32
  }
  func.func @transform_16(%arg0: i32) -> (i32, i32) {
    %c0_i32 = arith.constant 0 : i32
    %c0_i32_0 = arith.constant 0 : i32
    %c0_i32_1 = arith.constant 0 : i32
    return %c0_i32, %c0_i32_0 : i32, i32
  }
  func.func @transform_17(%arg0: i32) -> (i32, i32) {
    %c0_i32 = arith.constant 0 : i32
    %c0_i32_0 = arith.constant 0 : i32
    %c0_i32_1 = arith.constant 0 : i32
    return %c0_i32, %c0_i32_0 : i32, i32
  }
  func.func @transform_18(%arg0: i32) -> (i32, i32) {
    %c0_i32 = arith.constant 0 : i32
    %c0_i32_0 = arith.constant 0 : i32
    return %arg0, %c0_i32 : i32, i32
  }
}

</mosaic_0001>

<bundles_post_ra>
// kernel: mnt_forward.1
= control target key start
LH: loop header
LB: loop body
LE: loop exit
PB: predicated region body
PF: predicated region fallthrough
CT: control target
= control target key end

     0   :  { %s1920_s27 = smov 0   ;;  %s2238_s0 = inlined_call_operand.vmem [shape: f32[48,64], index: 0, kind: input, shape index: {}]   ;;  %s2239_s1 = inlined_call_operand.vmem [shape: f32[24,32], index: 1, kind: input, shape index: {}]   ;;  %s2240_s2 = inlined_call_operand.vmem [shape: f32[24,1], index: 2, kind: input, shape index: {}]   ;;  %s2241_s3 = inlined_call_operand.vmem [shape: f32[24,1], index: 3, kind: input, shape index: {}]   ;;  %s2242_s4 = inlined_call_operand.vmem [shape: f32[64,32], index: 4, kind: input, shape index: {}]   ;;  %s2243_s5 = inlined_call_operand.vmem [shape: f32[1,32], index: 5, kind: input, shape index: {}]   ;;  %s2244_s6 = inlined_call_operand.vmem [shape: f32[1,32], index: 6, kind: input, shape index: {}]   ;;  %s2245_s7 = inlined_call_operand.vmem [shape: f32[1,32], index: 7, kind: input, shape index: {}]   ;;  %s2246_s8 = inlined_call_operand.vmem [shape: f32[32,64], index: 8, kind: input, shape index: {}]   ;;  %s2247_s9 = inlined_call_operand.vmem [shape: f32[1,64], index: 9, kind: input, shape index: {}]   ;;  %s2248_s10 = inlined_call_operand.vmem [shape: f32[64,32], index: 10, kind: input, shape index: {}]   ;;  %s2249_s11 = inlined_call_operand.vmem [shape: f32[1,32], index: 11, kind: input, shape index: {}]   ;;  %s2250_s12 = inlined_call_operand.vmem [shape: f32[1,32], index: 12, kind: input, shape index: {}]   ;;  %s2251_s13 = inlined_call_operand.vmem [shape: f32[1,32], index: 13, kind: input, shape index: {}]   ;;  %s2252_s14 = inlined_call_operand.vmem [shape: f32[3,32], index: 14, kind: input, shape index: {}]   ;;  %s2253_s15 = inlined_call_operand.vmem [shape: f32[1,32], index: 15, kind: input, shape index: {}]   ;;  %s2254_s16 = inlined_call_operand.vmem [shape: f32[1,32], index: 16, kind: input, shape index: {}]   ;;  %s2255_s17 = inlined_call_operand.vmem [shape: f32[1,32], index: 17, kind: input, shape index: {}]   ;;  %s2256_s18 = inlined_call_operand.vmem [shape: f32[48,32], index: 18, kind: output, shape index: {}]  }
   0x1   :  { %2259 = sst [smem:[#allocation2_spill]] %s2238_s0 }
   0x2   :  { %2260 = sst [smem:[#allocation3_spill]] %s2239_s1 }
   0x3   :  { %2261 = sst [smem:[#allocation4_spill]] %s2240_s2 }
   0x4 LB: > { %s1517_s28 = sadd.s32 4294967295, %s1819_s27   ;;  %p1521_p0 = scmp.ge.s32.totalorder %s1819_s27, 1  ;;  %s1819_s27 = sphi %s1920_s27, %s28_s27  }
   0x5   : > { %p513_p1 = scmp.lt.s32.totalorder %s1819_s27, 3 }
   0x7   : > { %p514_p2 = pnand %p1521_p0, %p513_p1 }
   0x8   : > { %v582_v0 = vld [vmem:[%s2242_s4] sm:$0xff] (!%p514_p2)  ;;  %v583_v1 = vld [vmem:[%s2242_s4 + $0x8] sm:$0xff] (!%p514_p2)  ;;  %v584_v2 = vld [vmem:[%s2242_s4 + $0x10] sm:$0xff] (!%p514_p2)  ;;  %v1821_v3 = vmov (!%p514_p2), 0.0|0.0   ;;  %vm1822_vm0 = vmmov (!%p514_p2), 0   ;;  %v1823_v6 = vmov (!%p514_p2), 0.0  }
   0x9   : > { %517 = sbr.rel (%p514_p2) target bundleno = 2487 (0x9b7), region = 92  ;;  %1707 = vmatprep.subr.bf16.mxu0 (!%p514_p2), %v1821_v3  ;;  %v1708_v4 = vpack.c.bf16 (!%p514_p2), %v583_v1, %v582_v0  ;;  %v585_v5 = vld [vmem:[%s2242_s4 + $0x18] sm:$0xff] (!%p514_p2)  ;;  %1614 = vmatprep.mubr.msk.f32.mxu0 (!%p514_p2), %vm1822_vm0, %v1823_v6  ;;  %v586_v8 = vld [vmem:[%s2242_s4 + $0x20] sm:$0xff] (!%p514_p2)  ;;  %v587_v9 = vld [vmem:[%s2242_s4 + $0x28] sm:$0xff] (!%p514_p2)  ;;  %s2262_s21 = sld [smem:[#allocation2_spill]] (!%p514_p2)  ;;  %vm597_vm1 = vcmask (!%p514_p2), 523264  }
   0xa   : > { %s567_s2 = smul.u32 (!%p514_p2), 3, %s1517_s28  ;;  %1719 = vmatprep.subr.bf16.mxu1 (!%p514_p2), %v1821_v3  ;;  %1631 = vmatprep.mubr.msk.f32.mxu1 (!%p514_p2), %vm1822_vm0, %v1823_v6  ;;  %v1711_v7 = vpack.c.bf16 (!%p514_p2), %v585_v5, %v584_v2  ;;  %v1714_v10 = vpack.c.bf16 (!%p514_p2), %v587_v9, %v586_v8  ;;  %v588_v11 = vld [vmem:[%s2242_s4 + $0x30] sm:$0xff] (!%p514_p2)  ;;  %v589_v12 = vld [vmem:[%s2242_s4 + $0x38] sm:$0xff] (!%p514_p2)  ;;  %v1524_v17 = vld [vmem:[%s2243_s5] ss:$0 sm:$0xff] (!%p514_p2)  ;;  %vm689_vm2 = vcmask (!%p514_p2), 261120  }
   0xb   : > { %1709 = vmatpush3.bf16.msra.mxu0 (!%p514_p2), %v1708_v4  ;;  %v1717_v13 = vpack.c.bf16 (!%p514_p2), %v589_v12, %v588_v11  ;;  %v1824_v30 = vmov (!%p514_p2), 0   ;;  %s2263_s28 = sld [smem:[#allocation4_spill]] (!%p514_p2)  ;;  %v775_v43 = vld [vmem:[%s2246_s8] sm:$0xff] (!%p514_p2)  ;;  %v776_v44 = vld [vmem:[%s2246_s8 + $0x8] sm:$0xff] (!%p514_p2)  ;;  %v777_v46 = vld [vmem:[%s2246_s8 + $0x10] sm:$0xff] (!%p514_p2)  ;;  %s2264_s23 = sld [smem:[#allocation3_spill]] (!%p514_p2) }
   0xc   : > { %p568_p3 = scmp.lt.s32.totalorder (!%p514_p2), %s567_s2, 5  ;;  %1710 = vmatprep.subr.bf16.mxu0 (!%p514_p2), %v1821_v3  ;;  %1776 = vset.pattern.permute.xlu1 (!%p514_p2), %v1824_v30  ;;  %v1720_v45 = vpack.c.bf16 (!%p514_p2), %v776_v44, %v775_v43  ;;  %v778_v47 = vld [vmem:[%s2246_s8 + $0x18] sm:$0xff] (!%p514_p2)  ;;  %v1528_v62 = vld [vmem:[%s2244_s6] ss:$0 sm:$0xff] (!%p514_p2) }
   0xd   : > { %1775 = vset.pattern.permute.xlu0 (!%p514_p2), %v1824_v30  ;;  %v1723_v48 = vpack.c.bf16 (!%p514_p2), %v778_v47, %v777_v46  ;;  %v1529_v0 = vld [vmem:[%s2245_s7] ss:$0 sm:$0xff] (!%p514_p2) }
   0xe   : > { %1721 = vmatpush3.bf16.msra.mxu1 (!%p514_p2), %v1720_v45 }
   0xf   : > { %1712 = vmatpush3.bf16.msra.mxu0 (!%p514_p2), %v1711_v7  ;;  %1722 = vmatprep.subr.bf16.mxu1 (!%p514_p2), %v1821_v3 }
  0x10   : > { %s2266_s2 = smov (!%p568_p3, %s567_s2), 5  ;;  %1713 = vmatprep.subr.bf16.mxu0 %v1821_v3 }
  0x11   : > { %s1522_s19 = sshll.u32 %s2266_s2, 3  ;;  %v749_v41 = vld [vmem:[%s2263_s28 + $0x8] sm:$0xff]  ;;  %v748_v42 = vld [vmem:[%s2263_s28] sm:$0xff]  ;;  %v750_v54 = vld [vmem:[%s2263_s28 + $0x10] sm:$0xff] }
  0x12   : > { %s571_s22 = scalar_lea.vmem %s2262_s21, %s1522_s19  ;;  %1724 = vmatpush3.bf16.msra.mxu1 %v1723_v48  ;;  %v769_v8 = vld [vmem:[%s2264_s23] sm:$0xff]  ;;  %s577_s30 = scalar_lea.vmem %s2256_s18, %s1522_s19 }
  0x13   : > { %1715 = vmatpush3.bf16.msra.mxu0 %v1714_v10  ;;  %v579_v14 = vld [vmem:[%s571_s22] sm:$0xff]  ;;  %v580_v15 = vld [vmem:[%s571_s22 + $0x8] sm:$0xff]  ;;  %v581_v16 = vld [vmem:[%s571_s22 + $0x10] sm:$0xff]  ;;  %1725 = vmatprep.subr.bf16.mxu1 %v1821_v3 }
  0x14   : > { %1716 = vmatprep.subr.bf16.mxu0 %v1821_v3 }
  0x17   : > { %1718 = vmatpush3.bf16.msra.mxu0 %v1717_v13  ;;  %v770_v13 = vld [vmem:[%s2264_s23 + $0x8] sm:$0xff] }
  0x18   : > { %1737 = vmatprep.subr.bf16.mxu0 %v1821_v3 }
  0x1a   : > { %1615 = vmatmul.mubr.msk.f32.vlgmr.msra.gmra.mrb[0].mxu0 %vm597_vm1, %v579_v14 }
  0x1b   : > { %1617 = vmatprep.mubr.msk.f32.mxu0 %vm1822_vm0, %v1823_v6  ;;  %1739 = vmatpush3.bf16.msra.mxu0 %v1720_v45 }
  0x1c   : > { %1740 = vmatprep.subr.bf16.mxu0 %v1821_v3 }
  0x1e   : > { %1618 = vmatmul.mubr.msk.f32.gmra.mrb[2].mxu0 %vm597_vm1, %v580_v15 }
  0x1f   : > { %1620 = vmatprep.mubr.msk.f32.mxu0 %vm1822_vm0, %v1823_v6  ;;  %1742 = vmatpush3.bf16.msra.mxu0 %v1723_v48 }
  0x20   : > { %1743 = vmatprep.subr.bf16.mxu0 %v1821_v3 }
  0x22   : > { %1621 = vmatmul.mubr.msk.f32.gmra.mrb[4].mxu0 %vm597_vm1, %v581_v16 }
  0x23   : > { %1673 = vmatprep.mubr.msk.f32.mxu0 %vm1822_vm0, %v1823_v6 }
  0xed   : > { %v673_v18 = vpop.f32.mrb[0].mxu0 }
  0xee   : > { %v674_v19 = vadd.f32 %v1524_v17, %v673_v18  ;;  %v1616_v20 = vpop.f32.mrb[1].mxu0 }
  0xf0   : > { %v690_v21 = vsel %vm689_vm2, %v674_v19, 0.0 }
  0xf1   : > { %691 = vadd.xlane.f32.xlu0 %v690_v21  ;;  %v678_v22 = vpop.f32.mrb[2].mxu0 }
  0xf2   : > { %v679_v23 = vadd.f32 %v1524_v17, %v678_v22  ;;  %v1619_v24 = vpop.f32.mrb[3].mxu0 }
  0xf3   : > { %v771_v24 = vld [vmem:[%s2264_s23 + $0x10] sm:$0xff] }
  0xf4   : > { %v693_v25 = vsel %vm689_vm2, %v679_v23, 0.0 }
  0xf5   : > { %694 = vadd.xlane.f32.xlu0 %v693_v25  ;;  %v683_v26 = vpop.f32.mrb[4].mxu0 }
  0xf6   : > { %v684_v27 = vadd.f32 %v1524_v17, %v683_v26  ;;  %v1622_v28 = vpop.f32.mrb[5].mxu0 }
  0xf7   : > { %v780_v28 = vld [vmem:[%s2248_s10] sm:$0xff] }
  0xf8   : > { %v696_v29 = vsel %vm689_vm2, %v684_v27, 0.0 }
  0xf9   : > { %697 = vadd.xlane.f32.xlu1 %v696_v29  ;;  %v781_v29 = vld [vmem:[%s2248_s10 + $0x8] sm:$0xff] }
  0xfa   : > { %v2052_v30 = vpack.c.bf16 %v781_v29, %v780_v28  ;;  %v1068_v29 = vld [vmem:[%s2241_s3] sm:$0xff] }
 0x17e   : > { %v692_v31 = vpop.xlane.xlu0 %691 }
 0x17f   : > { %v700_v32 = vmul.f32 0.03125, %v692_v31  ;;  %v782_v31 = vld [vmem:[%s2248_s10 + $0x10] sm:$0xff] }
 0x181   : > { %v703_v33 = vsub.f32 %v674_v19, %v700_v32  ;;  %v783_v32 = vld [vmem:[%s2248_s10 + $0x18] sm:$0xff] }
 0x182   : > { %v695_v34 = vpop.xlane.xlu0 %694 }
 0x183   : > { %v701_v35 = vmul.f32 0.03125, %v695_v34  ;;  %v706_v36 = vmul.f32 %v703_v33, %v703_v33  ;;  %v784_v34 = vld [vmem:[%s2248_s10 + $0x20] sm:$0xff] }
 0x185   : > { %v704_v37 = vsub.f32 %v679_v23, %v701_v35  ;;  %v709_v38 = vsel %vm689_vm2, %v706_v36, 0.0  ;;  %v785_v35 = vld [vmem:[%s2248_s10 + $0x28] sm:$0xff] }
 0x186   : > { %710 = vadd.xlane.f32.xlu1 %v709_v38  ;;  %v698_v49 = vpop.xlane.xlu1 %697  ;;  %v2072_v36 = vpack.c.bf16 %v785_v35, %v784_v34  ;;  %v787_v38 = vld [vmem:[%s2248_s10 + $0x38] sm:$0xff] }
 0x187   : > { %v707_v39 = vmul.f32 %v704_v37, %v704_v37  ;;  %v702_v50 = vmul.f32 0.03125, %v698_v49 }
 0x189   : > { %v712_v40 = vsel %vm689_vm2, %v707_v39, 0.0  ;;  %v705_v51 = vsub.f32 %v684_v27, %v702_v50 }
 0x18a   : > { %713 = vadd.xlane.f32.xlu0 %v712_v40  ;;  %v2089_v40 = vld [vmem:[%s2247_s9] ss:$0 sm:$0xff] }
 0x18b   : > { %v708_v52 = vmul.f32 %v705_v51, %v705_v51 }
 0x18d   : > { %v715_v53 = vsel %vm689_vm2, %v708_v52, 0.0 }
 0x197   : > { %758 = vperm.xlu1 %1776, %v749_v41  }
 0x1a0   : > { %753 = vperm.xlu0 %1775, %v748_v42  }
 0x1bb   : > { %716 = vadd.xlane.f32.xlu1 %v715_v53 }
 0x1cc   : > { %763 = vperm.xlu1 %1776, %v750_v54  }
 0x213   : > { %v711_v55 = vpop.xlane.xlu1 %710 }
 0x214   : > { %v718_v56 = vmul.f32 0.03125, %v711_v55 }
 0x216   : > { %v721_v57 = vadd.f32 1e-05, %v718_v56 }
 0x217   : > { %v714_v58 = vpop.xlane.xlu0 %713  ;;  %v759_v14 = vpop.permute.xlu1 %758 }
 0x218   : > { %1777 = vrsqrt.f32 %v721_v57  ;;  %v719_v59 = vmul.f32 0.03125, %v714_v58 }
 0x21a   : > { %v722_v60 = vadd.f32 1e-05, %v719_v59 }
 0x21c   : > { %1779 = vrsqrt.f32 %v722_v60 }
 0x21f   : > { %v754_v4 = vpop.permute.xlu0 %753 }
 0x222   : > { %v1778_v61 = vpop.eup %1777 }
 0x223   : > { %v727_v63 = vmul.f32 %v1778_v61, %v703_v33  ;;  %v2062_v33 = vpack.c.bf16 %v783_v32, %v782_v31 }
 0x225   : > { %v736_v1 = vmul.f32 %v1528_v62, %v727_v63 }
 0x226   : > { %v1780_v2 = vpop.eup %1779 }
 0x227   : > { %v728_v5 = vmul.f32 %v1780_v2, %v704_v37  ;;  %v745_v7 = vadd.f32 %v1529_v0, %v736_v1  ;;  %v786_v37 = vld [vmem:[%s2248_s10 + $0x30] sm:$0xff] }
 0x228   : > { %v2082_v39 = vpack.c.bf16 %v787_v38, %v786_v37  ;;  %v1070_v38 = vld [vmem:[%s2241_s3 + $0x10] sm:$0xff] }
 0x229   : > { %v737_v9 = vmul.f32 %v1528_v62, %v728_v5  ;;  %v766_v10 = vmul.f32 %v754_v4, %v745_v7 }
 0x22b   : > { %v746_v11 = vadd.f32 %v1529_v0, %v737_v9  ;;  %v2022_v12 = vadd.f32 %v769_v8, %v766_v10 }
 0x22d   : > { %v767_v15 = vmul.f32 %v759_v14, %v746_v11  ;;  %1632 = vmatmul.mubr.msk.f32.vlgmr.msra.gmra.mrb[0].mxu1 %vm689_vm2, %v2022_v12 }
 0x22e   : > { %1634 = vmatprep.mubr.msk.f32.mxu1 %vm1822_vm0, %v1823_v6  ;;  %1727 = vmatpush3.bf16.msra.mxu1 %v2052_v30 }
 0x22f   : > { %v2031_v16 = vadd.f32 %v770_v13, %v767_v15  ;;  %1728 = vmatprep.subr.bf16.mxu1 %v1821_v3 }
 0x231   : > { %1635 = vmatmul.mubr.msk.f32.gmra.mrb[2].mxu1 %vm689_vm2, %v2031_v16 }
 0x232   : > { %1637 = vmatprep.mubr.msk.f32.mxu1 %vm1822_vm0, %v1823_v6  ;;  %1730 = vmatpush3.bf16.msra.mxu1 %v2062_v33 }
 0x233   : > { %1731 = vmatprep.subr.bf16.mxu1 %v1821_v3 }
 0x236   : > { %1733 = vmatpush3.bf16.msra.mxu1 %v2072_v36 }
 0x237   : > { %1734 = vmatprep.subr.bf16.mxu1 %v1821_v3 }
 0x23a   : > { %1736 = vmatpush3.bf16.msra.mxu1 %v2082_v39 }
 0x23b   : > { %1755 = vmatprep.subr.bf16.mxu1 %v1821_v3 }
 0x248   : > { %v717_v17 = vpop.xlane.xlu1 %716 }
 0x249   : > { %v720_v18 = vmul.f32 0.03125, %v717_v17  ;;  %v2113_v17 = vld [vmem:[%s2249_s11] ss:$0 sm:$0xff] }
 0x24b   : > { %v723_v19 = vadd.f32 1e-05, %v720_v18 }
 0x24c   : > { %v764_v25 = vpop.permute.xlu1 %763 }
 0x24d   : > { %1781 = vrsqrt.f32 %v723_v19 }
 0x257   : > { %v1782_v20 = vpop.eup %1781 }
 0x258   : > { %v729_v21 = vmul.f32 %v1782_v20, %v705_v51 }
 0x25a   : > { %v738_v22 = vmul.f32 %v1528_v62, %v729_v21 }
 0x25c   : > { %v747_v23 = vadd.f32 %v1529_v0, %v738_v22 }
 0x25e   : > { %v768_v26 = vmul.f32 %v764_v25, %v747_v23 }
 0x260   : > { %v2040_v27 = vadd.f32 %v771_v24, %v768_v26 }
 0x262   : > { %1638 = vmatmul.mubr.msk.f32.gmra.mrb[4].mxu1 %vm689_vm2, %v2040_v27 }
 0x263   : > { %1656 = vmatprep.mubr.msk.f32.mxu1 %vm1822_vm0, %v1823_v6 }
 0x300   : > { %v872_v41 = vpop.f32.mrb[0].mxu1 }
 0x301   : > { %v873_v42 = vadd.f32 %v2089_v40, %v872_v41  ;;  %v1633_v43 = vpop.f32.mrb[1].mxu1 }
 0x303   : > { %v886_v44 = vmul.f32 %v873_v42, %v873_v42 }
 0x304   : > { %v877_v45 = vpop.f32.mrb[2].mxu1 }
 0x305   : > { %v889_v46 = vmul.f32 %v886_v44, %v873_v42  ;;  %v878_v47 = vadd.f32 %v2089_v40, %v877_v45  ;;  %v1636_v48 = vpop.f32.mrb[3].mxu1 }
 0x307   : > { %v892_v49 = vmul.f32 0.044715, %v889_v46  ;;  %v887_v50 = vmul.f32 %v878_v47, %v878_v47 }
 0x309   : > { %v895_v51 = vadd.f32 %v892_v49, %v873_v42  ;;  %v890_v52 = vmul.f32 %v887_v50, %v878_v47 }
 0x30b   : > { %v898_v53 = vmul.f32 0.7978846, %v895_v51  ;;  %v893_v54 = vmul.f32 0.044715, %v890_v52 }
 0x30d   : > { %1783 = vtanh.f32 %v898_v53  ;;  %v896_v55 = vadd.f32 %v893_v54, %v878_v47 }
 0x30f   : > { %v899_v56 = vmul.f32 0.7978846, %v896_v55 }
 0x311   : > { %1785 = vtanh.f32 %v899_v56  ;;  %v1069_v56 = vld [vmem:[%s2241_s3 + $0x8] sm:$0xff] }
 0x317   : > { %v1784_v57 = vpop.eup %1783 }
 0x318   : > { %v904_v58 = vadd.f32 1.0, %v1784_v57 }
 0x31a   : > { %v907_v59 = vmul.f32 0.5, %v904_v58 }
 0x31b   : > { %v1786_v60 = vpop.eup %1785 }
 0x31c   : > { %v910_v61 = vmul.f32 %v907_v59, %v873_v42  ;;  %v905_v62 = vadd.f32 1.0, %v1786_v60 }
 0x31e   : > { %1657 = vmatmul.mubr.msk.f32.vlgmr.msra.gmra.mrb[6].mxu1 %vm597_vm1, %v910_v61  ;;  %v908_v63 = vmul.f32 0.5, %v905_v62 }
 0x31f   : > { %1659 = vmatprep.mubr.msk.f32.mxu1 %vm1822_vm0, %v1823_v6  ;;  %1759 = vmatpush3.bf16.msra.mxu1 %v2052_v30 }
 0x320   : > { %v911_v0 = vmul.f32 %v908_v63, %v878_v47  ;;  %1756 = vmatprep.subr.bf16.mxu1 %v1821_v3 }
 0x322   : > { %1660 = vmatmul.mubr.msk.f32.gmra.mrb[8].mxu1 %vm597_vm1, %v911_v0 }
 0x323   : > { %1662 = vmatprep.mubr.msk.f32.mxu1 %vm1822_vm0, %v1823_v6  ;;  %1760 = vmatpush3.bf16.msra.mxu1 %v2062_v33 }
 0x324   : > { %1757 = vmatprep.subr.bf16.mxu1 %v1821_v3 }
 0x327   : > { %1761 = vmatpush3.bf16.msra.mxu1 %v2072_v36 }
 0x328   : > { %1758 = vmatprep.subr.bf16.mxu1 %v1821_v3 }
 0x32b   : > { %1762 = vmatpush3.bf16.msra.mxu1 %v2082_v39 }
 0x335   : > { %v882_v1 = vpop.f32.mrb[4].mxu1 }
 0x336   : > { %v883_v2 = vadd.f32 %v2089_v40, %v882_v1  ;;  %v1639_v4 = vpop.f32.mrb[5].mxu1 }
 0x338   : > { %v888_v5 = vmul.f32 %v883_v2, %v883_v2 }
 0x33a   : > { %v891_v7 = vmul.f32 %v888_v5, %v883_v2 }
 0x33c   : > { %v894_v8 = vmul.f32 0.044715, %v891_v7 }
 0x33e   : > { %v897_v9 = vadd.f32 %v894_v8, %v883_v2  ;;  %v2139_v8 = vld [vmem:[%s2250_s12] ss:$0 sm:$0xff] }
 0x340   : > { %v900_v10 = vmul.f32 0.7978846, %v897_v9 }
 0x342   : > { %1787 = vtanh.f32 %v900_v10 }
 0x34c   : > { %v1788_v11 = vpop.eup %1787 }
 0x34d   : > { %v906_v13 = vadd.f32 1.0, %v1788_v11 }
 0x34f   : > { %v909_v14 = vmul.f32 0.5, %v906_v13  ;;  %v2146_v13 = vld [vmem:[%s2251_s13] ss:$0 sm:$0xff] }
 0x351   : > { %v912_v15 = vmul.f32 %v909_v14, %v883_v2  ;;  %v1092_v14 = vlaneseq }
 0x353   : > { %1663 = vmatmul.mubr.msk.f32.gmra.mrb[10].mxu1 %vm597_vm1, %v912_v15 }
 0x354   : > { %1701 = vmatprep.mubr.msk.f32.mxu1 %vm1822_vm0, %v1823_v6 }
 0x3f1   : > { %v994_v18 = vpop.f32.mrb[6].mxu1 }
 0x3f2   : > { %v995_v19 = vadd.f32 %v2113_v17, %v994_v18  ;;  %v1658_v20 = vpop.f32.mrb[7].mxu1 }
 0x3f4   : > { %v1008_v21 = vadd.f32 %v995_v19, %v2022_v12 }
 0x3f5   : > { %v999_v22 = vpop.f32.mrb[8].mxu1 }
 0x3f6   : > { %v1000_v23 = vadd.f32 %v2113_v17, %v999_v22  ;;  %v1661_v24 = vpop.f32.mrb[9].mxu1  ;;  %v1011_v25 = vsel %vm689_vm2, %v1008_v21, 0.0 }
 0x3f7   : > { %1012 = vadd.xlane.f32.xlu1 %v1011_v25 }
 0x3f8   : > { %v1009_v26 = vadd.f32 %v1000_v23, %v2031_v16 }
 0x3fa   : > { %v1014_v28 = vsel %vm689_vm2, %v1009_v26, 0.0 }
 0x3fb   : > { %1015 = vadd.xlane.f32.xlu1 %v1014_v28  ;;  %v1105_v28 = vld [vmem:[%s2252_s14] sm:$0x7] }
 0x40c   : > { %1073 = vperm.xlu1 %1776, %v1068_v29  }
 0x426   : > { %v1004_v31 = vpop.f32.mrb[10].mxu1 }
 0x427   : > { %v1005_v32 = vadd.f32 %v2113_v17, %v1004_v31  ;;  %v1664_v34 = vpop.f32.mrb[11].mxu1 }
 0x429   : > { %v1010_v35 = vadd.f32 %v1005_v32, %v2040_v27 }
 0x42b   : > { %v1017_v37 = vsel %vm689_vm2, %v1010_v35, 0.0 }
 0x42c   : > { %1018 = vadd.xlane.f32.xlu0 %v1017_v37 }
 0x442   : > { %1083 = vperm.xlu0 %1775, %v1070_v38  }
 0x484   : > { %v1013_v41 = vpop.xlane.xlu1 %1012 }
 0x485   : > { %v1020_v42 = vmul.f32 0.03125, %v1013_v41 }
 0x487   : > { %v1023_v43 = vsub.f32 %v1008_v21, %v1020_v42  ;;  %v1093_v21 = vshrl.u32 %v1092_v14, 7 }
 0x488   : > { %v1016_v44 = vpop.xlane.xlu1 %1015 }
 0x489   : > { %v1021_v45 = vmul.f32 0.03125, %v1016_v44  ;;  %v1026_v46 = vmul.f32 %v1023_v43, %v1023_v43  ;;  %v1108_v23 = vsub.s32 0, %v1093_v21  ;;  %vm1094_vm3 = vcmp.lt.s32.totalorder %v1093_v21, 1 }
 0x48a   : > { %v1115_v31 = vsub.s32 1, %v1093_v21  ;;  %v1125_v38 = vsub.s32 2, %v1093_v21  ;;  %vm1101_vm4 = vcmp.lt.s32.totalorder %v1093_v21, 7 }
 0x48b   : > { %v1024_v47 = vsub.f32 %v1009_v26, %v1021_v45  ;;  %v1029_v48 = vsel %vm689_vm2, %v1026_v46, 0.0  ;;  %v1109_v32 = vrot.slane %v1105_v28, %v1108_v23 }
 0x48c   : > { %1030 = vadd.xlane.f32.xlu1 %v1029_v48  ;;  %v1074_v57 = vpop.permute.xlu1 %1073  ;;  %v1116_v42 = vrot.slane %v1105_v28, %v1115_v31 }
 0x48d   : > { %v1027_v49 = vmul.f32 %v1024_v47, %v1024_v47 }
 0x48f   : > { %v1032_v50 = vsel %vm689_vm2, %v1027_v49, 0.0  ;;  %v1126_v49 = vrot.slane %v1105_v28, %v1125_v38 }
 0x490   : > { %1033 = vadd.xlane.f32.xlu1 %v1032_v50 }
 0x4b9   : > { %v1019_v51 = vpop.xlane.xlu0 %1018 }
 0x4ba   : > { %v1022_v52 = vmul.f32 0.03125, %v1019_v51 }
 0x4bc   : > { %v1025_v53 = vsub.f32 %v1010_v35, %v1022_v52 }
 0x4be   : > { %v1028_v54 = vmul.f32 %v1025_v53, %v1025_v53 }
 0x4c0   : > { %v1035_v55 = vsel %vm689_vm2, %v1028_v54, 0.0 }
 0x4c1   : > { %1036 = vadd.xlane.f32.xlu1 %v1035_v55  ;;  %v1084_v41 = vpop.permute.xlu0 %1083 }
 0x4d2   : > { %1078 = vperm.xlu1 %1776, %v1069_v56  }
 0x519   : > { %v1031_v58 = vpop.xlane.xlu1 %1030 }
 0x51a   : > { %v1038_v60 = vmul.f32 0.03125, %v1031_v58 }
 0x51c   : > { %v1041_v62 = vadd.f32 1e-05, %v1038_v60 }
 0x51d   : > { %v1034_v59 = vpop.xlane.xlu1 %1033 }
 0x51e   : > { %v1039_v61 = vmul.f32 0.03125, %v1034_v59  ;;  %1789 = vrsqrt.f32 %v1041_v62  ;;  %v1540_v62 = vld [vmem:[%s2253_s15] ss:$0 sm:$0xff] }
 0x520   : > { %v1042_v63 = vadd.f32 1e-05, %v1039_v61 }
 0x522   : > { %1791 = vrsqrt.f32 %v1042_v63 }
 0x528   : > { %v1790_v0 = vpop.eup %1789 }
 0x529   : > { %v1047_v2 = vmul.f32 %v1790_v0, %v1023_v43 }
 0x52b   : > { %v1056_v11 = vmul.f32 %v2139_v8, %v1047_v2 }
 0x52c   : > { %v1792_v1 = vpop.eup %1791 }
 0x52d   : > { %v1048_v5 = vmul.f32 %v1792_v1, %v1024_v47  ;;  %v1065_v19 = vadd.f32 %v2146_v13, %v1056_v11 }
 0x52f   : > { %v1057_v10 = vmul.f32 %v2139_v8, %v1048_v5  ;;  %v1086_v22 = vmul.f32 %v1074_v57, %v1065_v19 }
 0x531   : > { %v1066_v18 = vadd.f32 %v2146_v13, %v1057_v10  ;;  %v1089_v29 = vrot.slane %v1086_v22, 7  ;;  %v1098_v47 = vrot.slane %v1086_v22, 1 }
 0x54e   : > { %v1037_v4 = vpop.xlane.xlu1 %1036 }
 0x54f   : > { %v1040_v7 = vmul.f32 0.03125, %v1037_v4 }
 0x551   : > { %v1043_v9 = vadd.f32 1e-05, %v1040_v7 }
 0x552   : > { %v1079_v15 = vpop.permute.xlu1 %1078 }
 0x553   : > { %1793 = vrsqrt.f32 %v1043_v9  ;;  %v1087_v20 = vmul.f32 %v1079_v15, %v1066_v18 }
 0x555   : > { %v1090_v24 = vrot.slane %v1087_v20, 7  ;;  %v1099_v43 = vrot.slane %v1087_v20, 1  ;;  %v1118_v46 = vmul.f32 %v1116_v42, %v1087_v20 }
 0x557   : > { %v1096_v35 = vsel %vm1094_vm3, %v1089_v29, %v1090_v24  ;;  %v1103_v52 = vsel %vm1101_vm4, %v1098_v47, %v1099_v43 }
 0x558   : > { %v1111_v44 = vmul.f32 %v1109_v32, %v1096_v35  ;;  %v1127_v63 = vmul.f32 %v1126_v49, %v1103_v52  ;;  %v1541_v52 = vld [vmem:[%s2254_s16] ss:$0 sm:$0xff] }
 0x55a   : > { %v1121_v51 = vadd.f32 %v1118_v46, %v1111_v44 }
 0x55d   : > { %v1794_v25 = vpop.eup %1793 }
 0x55e   : > { %v1049_v26 = vmul.f32 %v1794_v25, %v1025_v53  ;;  %v1117_v53 = vmul.f32 %v1116_v42, %v1086_v22 }
 0x560   : > { %v1058_v34 = vmul.f32 %v2139_v8, %v1049_v26 }
 0x562   : > { %v1067_v37 = vadd.f32 %v2146_v13, %v1058_v34 }
 0x564   : > { %v1088_v45 = vmul.f32 %v1084_v41, %v1067_v37 }
 0x566   : > { %v1100_v48 = vrot.slane %v1088_v45, 1  ;;  %v1091_v50 = vrot.slane %v1088_v45, 7  ;;  %v1119_v61 = vmul.f32 %v1116_v42, %v1088_v45 }
 0x568   : > { %v1102_v54 = vsel %vm1101_vm4, %v1099_v43, %v1100_v48  ;;  %v1097_v55 = vsel %vm1094_vm3, %v1091_v50, %v1089_v29  ;;  %v1095_v56 = vsel %vm1094_vm3, %v1090_v24, %v1091_v50  ;;  %v1104_v57 = vsel %vm1101_vm4, %v1100_v48, %v1098_v47 }
 0x569   : > { %v1128_v58 = vmul.f32 %v1126_v49, %v1102_v54  ;;  %v1110_v59 = vmul.f32 %v1109_v32, %v1097_v55  ;;  %v1112_v60 = vmul.f32 %v1109_v32, %v1095_v56  ;;  %v1129_v4 = vmul.f32 %v1126_v49, %v1104_v57  ;;  %v1542_v57 = vld [vmem:[%s2255_s17] ss:$0 sm:$0xff] }
 0x56b   : > { %v1131_v0 = vadd.f32 %v1128_v58, %v1121_v51  ;;  %v1120_v1 = vadd.f32 %v1117_v53, %v1110_v59  ;;  %v1122_v2 = vadd.f32 %v1119_v61, %v1112_v60 }
 0x56d   : > { %v1141_v5 = vadd.f32 %v1540_v62, %v1131_v0  ;;  %v1130_v7 = vadd.f32 %v1127_v63, %v1120_v1  ;;  %v1132_v9 = vadd.f32 %v1129_v4, %v1122_v2 }
 0x56f   : > { %v1148_v10 = vsel %vm689_vm2, %v1141_v5, 0.0  ;;  %v1140_v11 = vadd.f32 %v1540_v62, %v1130_v7  ;;  %v1142_v14 = vadd.f32 %v1540_v62, %v1132_v9 }
 0x570   : > { %1149 = vadd.xlane.f32.xlu0 %v1148_v10 }
 0x571   : > { %v1145_v15 = vsel %vm689_vm2, %v1140_v11, 0.0  ;;  %v1151_v18 = vsel %vm689_vm2, %v1142_v14, 0.0 }
 0x572   : > { %1146 = vadd.xlane.f32.xlu1 %v1145_v15 }
 0x574   : > { %1152 = vadd.xlane.f32.xlu0 %v1151_v18 }
 0x5fd   : > { %v1150_v19 = vpop.xlane.xlu0 %1149 }
 0x5fe   : > { %v1155_v20 = vmul.f32 0.03125, %v1150_v19 }
 0x5ff   : > { %v1147_v21 = vpop.xlane.xlu1 %1146 }
 0x600   : > { %v1158_v22 = vsub.f32 %v1141_v5, %v1155_v20  ;;  %v1154_v23 = vmul.f32 0.03125, %v1147_v21 }
 0x601   : > { %v1153_v24 = vpop.xlane.xlu0 %1152 }
 0x602   : > { %v1157_v25 = vsub.f32 %v1140_v11, %v1154_v23  ;;  %v1156_v26 = vmul.f32 0.03125, %v1153_v24  ;;  %v1161_v28 = vmul.f32 %v1158_v22, %v1158_v22 }
 0x604   : > { %v1159_v29 = vsub.f32 %v1142_v14, %v1156_v26  ;;  %v1166_v31 = vsel %vm689_vm2, %v1161_v28, 0.0  ;;  %v1160_v32 = vmul.f32 %v1157_v25, %v1157_v25 }
 0x605   : > { %1167 = vadd.xlane.f32.xlu0 %v1166_v31 }
 0x606   : > { %v1163_v34 = vsel %vm689_vm2, %v1160_v32, 0.0  ;;  %v1162_v35 = vmul.f32 %v1159_v29, %v1159_v29 }
 0x607   : > { %1164 = vadd.xlane.f32.xlu1 %v1163_v34 }
 0x608   : > { %v1169_v37 = vsel %vm689_vm2, %v1162_v35, 0.0 }
 0x60b   : > { %1170 = vadd.xlane.f32.xlu1 %v1169_v37 }
 0x692   : > { %v1168_v38 = vpop.xlane.xlu0 %1167 }
 0x693   : > { %v1173_v41 = vmul.f32 0.03125, %v1168_v38 }
 0x694   : > { %v1165_v42 = vpop.xlane.xlu1 %1164 }
 0x695   : > { %v1176_v43 = vadd.f32 1e-05, %v1173_v41  ;;  %v1172_v44 = vmul.f32 0.03125, %v1165_v42 }
 0x697   : > { %1795 = vrsqrt.f32 %v1176_v43  ;;  %v1175_v45 = vadd.f32 1e-05, %v1172_v44 }
 0x698   : > { %v1171_v46 = vpop.xlane.xlu1 %1170 }
 0x699   : > { %1797 = vrsqrt.f32 %v1175_v45  ;;  %v1174_v47 = vmul.f32 0.03125, %v1171_v46 }
 0x69b   : > { %v1177_v48 = vadd.f32 1e-05, %v1174_v47 }
 0x69d   : > { %1799 = vrsqrt.f32 %v1177_v48 }
 0x6a1   : > { %v1796_v49 = vpop.eup %1795 }
 0x6a2   : > { %v1182_v50 = vmul.f32 %v1796_v49, %v1158_v22 }
 0x6a3   : > { %v1798_v51 = vpop.eup %1797 }
 0x6a4   : > { %v1181_v53 = vmul.f32 %v1798_v51, %v1157_v25  ;;  %v1191_v55 = vmul.f32 %v1541_v52, %v1182_v50 }
 0x6a6   : > { %v1190_v54 = vmul.f32 %v1541_v52, %v1181_v53  ;;  %v1200_v61 = vadd.f32 %v1542_v57, %v1191_v55 }
 0x6a7   : > { %v1800_v56 = vpop.eup %1799 }
 0x6a8   : > { %v1199_v58 = vadd.f32 %v1542_v57, %v1190_v54  ;;  %v1183_v59 = vmul.f32 %v1800_v56, %v1159_v29  ;;  %v2182_v63 = vadd.f32 %v1200_v61, %v2031_v16 }
 0x6aa   : > { %v2174_v60 = vadd.f32 %v1199_v58, %v2022_v12  ;;  %v1192_v62 = vmul.f32 %v1541_v52, %v1183_v59 }
 0x6ac   : > { %1674 = vmatmul.mubr.msk.f32.vlgmr.msra.gmra.mrb[6].mxu0 %vm689_vm2, %v2174_v60  ;;  %v1201_v0 = vadd.f32 %v1542_v57, %v1192_v62 }
 0x6ad   : > { %1676 = vmatprep.mubr.msk.f32.mxu0 %vm1822_vm0, %v1823_v6  ;;  %1745 = vmatpush3.bf16.msra.mxu0 %v2052_v30 }
 0x6ae   : > { %1746 = vmatprep.subr.bf16.mxu0 %v1821_v3  ;;  %v2191_v12 = vadd.f32 %v1201_v0, %v2040_v27 }
 0x6b0   : > { %1677 = vmatmul.mubr.msk.f32.gmra.mrb[8].mxu0 %vm689_vm2, %v2182_v63 }
 0x6b1   : > { %1679 = vmatprep.mubr.msk.f32.mxu0 %vm1822_vm0, %v1823_v6  ;;  %1748 = vmatpush3.bf16.msra.mxu0 %v2062_v33 }
 0x6b2   : > { %1749 = vmatprep.subr.bf16.mxu0 %v1821_v3 }
 0x6b4   : > { %1680 = vmatmul.mubr.msk.f32.gmra.mrb[10].mxu0 %vm689_vm2, %v2191_v12 }
 0x6b5   : > { %1751 = vmatpush3.bf16.msra.mxu0 %v2072_v36  ;;  %1698 = vmatprep.mubr.msk.f32.mxu0 %vm1822_vm0, %v1823_v6 }
 0x6b6   : > { %1752 = vmatprep.subr.bf16.mxu0 %v1821_v3 }
 0x6b9   : > { %1754 = vmatpush3.bf16.msra.mxu0 %v2082_v39 }
 0x77f   : > { %v1280_v16 = vpop.f32.mrb[6].mxu0 }
 0x780   : > { %v1281_v30 = vadd.f32 %v2089_v40, %v1280_v16  ;;  %v1675_v33 = vpop.f32.mrb[7].mxu0 }
 0x782   : > { %v1294_v27 = vmul.f32 %v1281_v30, %v1281_v30 }
 0x783   : > { %v1285_v1 = vpop.f32.mrb[8].mxu0 }
 0x784   : > { %v1297_v2 = vmul.f32 %v1294_v27, %v1281_v30  ;;  %v1286_v4 = vadd.f32 %v2089_v40, %v1285_v1  ;;  %v1678_v5 = vpop.f32.mrb[9].mxu0 }
 0x786   : > { %v1300_v7 = vmul.f32 0.044715, %v1297_v2  ;;  %v1295_v9 = vmul.f32 %v1286_v4, %v1286_v4 }
 0x787   : > { %v1290_v36 = vpop.f32.mrb[10].mxu0 }
 0x788   : > { %v1303_v10 = vadd.f32 %v1300_v7, %v1281_v30  ;;  %v1298_v11 = vmul.f32 %v1295_v9, %v1286_v4  ;;  %v1291_v14 = vadd.f32 %v2089_v40, %v1290_v36  ;;  %v1681_v3 = vpop.f32.mrb[11].mxu0 }
 0x78a   : > { %v1306_v15 = vmul.f32 0.7978846, %v1303_v10  ;;  %v1301_v39 = vmul.f32 0.044715, %v1298_v11  ;;  %v1296_v18 = vmul.f32 %v1291_v14, %v1291_v14 }
 0x78c   : > { %1801 = vtanh.f32 %v1306_v15  ;;  %v1304_v19 = vadd.f32 %v1301_v39, %v1286_v4  ;;  %v1299_v20 = vmul.f32 %v1296_v18, %v1291_v14 }
 0x78e   : > { %v1307_v21 = vmul.f32 0.7978846, %v1304_v19  ;;  %v1302_v22 = vmul.f32 0.044715, %v1299_v20 }
 0x790   : > { %1803 = vtanh.f32 %v1307_v21  ;;  %v1305_v23 = vadd.f32 %v1302_v22, %v1291_v14 }
 0x792   : > { %v1308_v24 = vmul.f32 0.7978846, %v1305_v23 }
 0x794   : > { %1805 = vtanh.f32 %v1308_v24 }
 0x796   : > { %v1802_v25 = vpop.eup %1801 }
 0x797   : > { %v1312_v26 = vadd.f32 1.0, %v1802_v25 }
 0x799   : > { %v1315_v28 = vmul.f32 0.5, %v1312_v26 }
 0x79a   : > { %v1804_v29 = vpop.eup %1803 }
 0x79b   : > { %v1318_v31 = vmul.f32 %v1315_v28, %v1281_v30  ;;  %v1313_v32 = vadd.f32 1.0, %v1804_v29 }
 0x79d   : > { %v1316_v40 = vmul.f32 0.5, %v1313_v32  ;;  %1699 = vmatmul.mubr.msk.f32.vlgmr.msra.gmra.mrb[12].mxu0 %vm597_vm1, %v1318_v31 }
 0x79e   : > { %v1806_v34 = vpop.eup %1805 }
 0x79f   : > { %v1319_v35 = vmul.f32 %v1316_v40, %v1286_v4  ;;  %v1314_v37 = vadd.f32 1.0, %v1806_v34 }
 0x7a1   : > { %1702 = vmatmul.mubr.msk.f32.vlgmr.msra.gmra.mrb[12].mxu1 %vm597_vm1, %v1319_v35  ;;  %v1317_v38 = vmul.f32 0.5, %v1314_v37 }
 0x7a2   : > { %1704 = vmatprep.mubr.msk.f32.mxu1 %vm1822_vm0, %v1823_v6 }
 0x7a3   : > { %v1320_v41 = vmul.f32 %v1317_v38, %v1291_v14 }
 0x7a5   : > { %1705 = vmatmul.mubr.msk.f32.gmra.mrb[14].mxu1 %vm597_vm1, %v1320_v41 }
 0x870   : > { %v1396_v42 = vpop.f32.mrb[12].mxu0 }
 0x871   : > { %v1397_v43 = vadd.f32 %v2113_v17, %v1396_v42  ;;  %v1700_v44 = vpop.f32.mrb[13].mxu0 }
 0x873   : > { %v1410_v45 = vadd.f32 %v1397_v43, %v2174_v60 }
 0x874   : > { %v1401_v46 = vpop.f32.mrb[12].mxu1 }
 0x875   : > { %v1402_v47 = vadd.f32 %v2113_v17, %v1401_v46  ;;  %v1703_v48 = vpop.f32.mrb[13].mxu1  ;;  %v1413_v49 = vsel %vm689_vm2, %v1410_v45, 0.0 }
 0x876   : > { %1414 = vadd.xlane.f32.xlu0 %v1413_v49 }
 0x877   : > { %v1411_v50 = vadd.f32 %v1402_v47, %v2182_v63 }
 0x878   : > { %v1406_v51 = vpop.f32.mrb[14].mxu1 }
 0x879   : > { %v1407_v6 = vadd.f32 %v2113_v17, %v1406_v51  ;;  %v1706_v52 = vpop.f32.mrb[15].mxu1  ;;  %v1416_v53 = vsel %vm689_vm2, %v1411_v50, 0.0 }
 0x87a   : > { %1417 = vadd.xlane.f32.xlu1 %v1416_v53 }
 0x87b   : > { %v1412_v54 = vadd.f32 %v1407_v6, %v2191_v12 }
 0x87d   : > { %v1419_v55 = vsel %vm689_vm2, %v1412_v54, 0.0 }
 0x87e   : > { %1420 = vadd.xlane.f32.xlu0 %v1419_v55 }
 0x903   : > { %v1415_v56 = vpop.xlane.xlu0 %1414 }
 0x904   : > { %v1422_v57 = vmul.f32 0.03125, %v1415_v56 }
 0x906   : > { %v1425_v58 = vsub.f32 %v1410_v45, %v1422_v57 }
 0x907   : > { %v1418_v59 = vpop.xlane.xlu1 %1417 }
 0x908   : > { %v1423_v60 = vmul.f32 0.03125, %v1418_v59  ;;  %v1428_v61 = vmul.f32 %v1425_v58, %v1425_v58 }
 0x90a   : > { %v1426_v62 = vsub.f32 %v1411_v50, %v1423_v60  ;;  %v1431_v63 = vsel %vm689_vm2, %v1428_v61, 0.0 }
 0x90b   : > { %1432 = vadd.xlane.f32.xlu1 %v1431_v63  ;;  %v1421_v17 = vpop.xlane.xlu0 %1420 }
 0x90c   : > { %v1424_v0 = vmul.f32 0.03125, %v1421_v17  ;;  %v1429_v16 = vmul.f32 %v1426_v62, %v1426_v62 }
 0x90e   : > { %v1427_v30 = vsub.f32 %v1412_v54, %v1424_v0  ;;  %v1434_v33 = vsel %vm689_vm2, %v1429_v16, 0.0 }
 0x90f   : > { %1435 = vadd.xlane.f32.xlu0 %v1434_v33 }
 0x910   : > { %v1430_v12 = vmul.f32 %v1427_v30, %v1427_v30 }
 0x912   : > { %v1437_v27 = vsel %vm689_vm2, %v1430_v12, 0.0 }
 0x913   : > { %1438 = vadd.xlane.f32.xlu1 %v1437_v27 }
 0x998   : > { %v1433_v1 = vpop.xlane.xlu1 %1432 }
 0x999   : > { %v1440_v2 = vmul.f32 0.03125, %v1433_v1 }
 0x99b   : > { %v1443_v4 = vadd.f32 1e-05, %v1440_v2 }
 0x99c   : > { %v1436_v5 = vpop.xlane.xlu0 %1435 }
 0x99d   : > { %1807 = vrsqrt.f32 %v1443_v4  ;;  %v1441_v7 = vmul.f32 0.03125, %v1436_v5 }
 0x99f   : > { %v1444_v9 = vadd.f32 1e-05, %v1441_v7 }
 0x9a0   : > { %v1439_v36 = vpop.xlane.xlu1 %1438 }
 0x9a1   : > { %1809 = vrsqrt.f32 %v1444_v9  ;;  %v1442_v10 = vmul.f32 0.03125, %v1439_v36 }
 0x9a3   : > { %v1445_v11 = vadd.f32 1e-05, %v1442_v10 }
 0x9a5   : > { %1811 = vrsqrt.f32 %v1445_v11 }
 0x9a7   : > { %v1808_v14 = vpop.eup %1807 }
 0x9a8   : > { %v1449_v3 = vmul.f32 %v1808_v14, %v1425_v58 }
 0x9aa   : > { %v1452_v15 = vmul.f32 %v2139_v8, %v1449_v3 }
 0x9ab   : > { %v1810_v39 = vpop.eup %1809 }
 0x9ac   : > { %v1455_v18 = vadd.f32 %v2146_v13, %v1452_v15  ;;  %v1450_v19 = vmul.f32 %v1810_v39, %v1426_v62 }
 0x9ae   : > { %1458 = vst.msk [vmem:[%s577_s30] sm:$0xff] %vm689_vm2, %v1455_v18  ;;  %v1453_v20 = vmul.f32 %v2139_v8, %v1450_v19 }
 0x9af   : > { %v1812_v21 = vpop.eup %1811 }
 0x9b0   : > { %v1456_v22 = vadd.f32 %v2146_v13, %v1453_v20  ;;  %v1451_v23 = vmul.f32 %v1812_v21, %v1427_v30 }
 0x9b2   : > { %1459 = vst.msk [vmem:[%s577_s30 + $0x8] sm:$0xff] %vm689_vm2, %v1456_v22  ;;  %v1454_v24 = vmul.f32 %v2139_v8, %v1451_v23 }
 0x9b4   : > { %v1457_v25 = vadd.f32 %v2146_v13, %v1454_v24 }
 0x9b6   : > { %1460 = vst.msk [vmem:[%s577_s30 + $0x10] sm:$0xff] %vm689_vm2, %v1457_v25 }
 0x9b7 PF: > { %s28_s27 = sadd.s32 1, %s1819_s27  }
 0x9b8   : > { %p25_p4 = scmp.ge.s32.totalorder %s28_s27, 4  }
 0x9ba   :  { %27 = sbr.rel (!%p25_p4) target bundleno = 4 (0x4), region = 122 }

</bundles_post_ra>
